<compile_context>
chip_gen: v7x
topology: tpu7x:2x2x1
jax: 0.10.0
libtpu: 0.0.40
codegen_flags: <defaults>
</compile_context>

<pallas_src>
import jax
import jax.numpy as jnp
from jax.experimental import pallas as pl
from jax.experimental.pallas import tpu as pltpu

_NEG_SLOPE = 0.01  # PyTorch nn.LeakyReLU() default negative_slope


def _mlp_kernel(x_ref, w_ref, b_ref, o_ref):
    k = pl.program_id(2)

    @pl.when(k == 0)
    def _init():
        o_ref[...] = jnp.zeros_like(o_ref)

    # bf16 x bf16 -> f32 on the MXU; accumulate directly into the resident
    # f32 output block (its index_map ignores k, so it stays in VMEM across K).
    o_ref[...] += jnp.dot(x_ref[...], w_ref[...],
                          preferred_element_type=jnp.float32)

    # Epilogue (bias + LeakyReLU) once, at the last K step, in place.
    @pl.when(k == pl.num_programs(2) - 1)
    def _finalize():
        y = o_ref[...] + b_ref[...]            # (tm, tn) + (1, tn) broadcast
        o_ref[...] = jnp.where(y >= 0, y, _NEG_SLOPE * y)


def _round_up(x, m):
    return ((x + m - 1) // m) * m


def _pick_tile(dim, cap, align):
    """Return (tile, padded_dim).

    If the dimension fits under the cap, use the full dimension as the block
    shape (always legal, zero padding).  Otherwise pick a near-balanced,
    `align`-multiple tile no larger than `cap` (cap must be a multiple of
    `align`) and pad the dimension up to a multiple of it.
    """
    if dim <= cap:
        return dim, dim
    steps = -(-dim // cap)                       # cdiv
    tile = _round_up(-(-dim // steps), align)    # <= cap since cap % align == 0
    return tile, tile * steps


def mlp_forward(x, weight, bias, *, tm_cap=1024, tn_cap=1024, tk_cap=512):
    """Computes leaky_relu(x @ weight + bias, 0.01) on the TPU MXU.

    x:      [M, K]   (batch, input_dim)         — any float dtype
    weight: [K, N]   (PyTorch weight.T)
    bias:   [N]
    Returns [M, N] float32.
    """
    M, K = x.shape
    Kw, N = weight.shape
    assert Kw == K, "weight must be [input_dim, out_dim]"
    assert bias.shape == (N,)
    out_dtype = jnp.float32

    # Tile selection.  Alignment: M is a (bf16) sublane dim -> 16,
    # N and K are lane dims -> 128.  Caps are multiples of these.
    tm, M_pad = _pick_tile(M, tm_cap, 16)
    tn, N_pad = _pick_tile(N, tn_cap, 128)
    tk, K_pad = _pick_tile(K, tk_cap, 128)

    # bf16 MXU operands (f32 accumulation in-kernel keeps accuracy).  Any
    # padding needed (only when a dim exceeds its cap) fuses into this cast.
    x_p = x.astype(jnp.bfloat16)
    if (M_pad, K_pad) != (M, K):
        x_p = jnp.pad(x_p, ((0, M_pad - M), (0, K_pad - K)))
    w_p = weight.astype(jnp.bfloat16)
    if (K_pad, N_pad) != (K, N):
        w_p = jnp.pad(w_p, ((0, K_pad - K), (0, N_pad - N)))
    b_p = bias.astype(jnp.float32)
    if N_pad != N:
        b_p = jnp.pad(b_p, (0, N_pad - N))
    b_p = b_p.reshape(1, N_pad)

    grid = (M_pad // tm, N_pad // tn, K_pad // tk)

    # Actual pipeline traffic: x is streamed once per N tile, W once per M tile.
    cost = pl.CostEstimate(
        flops=2 * M_pad * N_pad * K_pad,
        transcendentals=0,
        bytes_accessed=(
            x_p.size * x_p.dtype.itemsize * grid[1]
            + w_p.size * w_p.dtype.itemsize * grid[0]
            + b_p.size * b_p.dtype.itemsize * grid[0]
            + M_pad * N_pad * jnp.dtype(out_dtype).itemsize),
    )

    out_p = pl.pallas_call(
        _mlp_kernel,
        out_shape=jax.ShapeDtypeStruct((M_pad, N_pad), out_dtype),
        grid_spec=pltpu.PrefetchScalarGridSpec(
            num_scalar_prefetch=0,
            grid=grid,
            in_specs=[
                pl.BlockSpec((tm, tk), lambda i, j, k: (i, k)),   # x tile (bf16)
                pl.BlockSpec((tk, tn), lambda i, j, k: (k, j)),   # W tile (bf16)
                pl.BlockSpec((1, tn), lambda i, j, k: (0, j)),    # bias tile (f32)
            ],
            out_specs=pl.BlockSpec((tm, tn), lambda i, j, k: (i, j)),
        ),
        compiler_params=pltpu.CompilerParams(
            # M/N parallel (megacore sharding on v7x when those axes have >=2
            # steps), K innermost + arbitrary (accumulation).
            dimension_semantics=("parallel", "parallel", "arbitrary"),
        ),
        cost_estimate=cost,
    )(x_p, w_p, b_p)

    if (M_pad, N_pad) != (M, N):
        out_p = out_p[:M, :N]
    return out_p


if __name__ == "__main__":
    # Small shapes consistent with the module's forward: x [B, input_dim].
    B, input_dim, out_dim = 8, 32, 16

    key = jax.random.PRNGKey(0)
    kx, kw, kb = jax.random.split(key, 3)

    x = jax.random.normal(kx, (B, input_dim), dtype=jnp.float32)
    # Deterministic params (mimics nn.Linear's uniform(-1/sqrt(in), 1/sqrt(in))).
    bound = 1.0 / jnp.sqrt(jnp.float32(input_dim))
    weight = jax.random.uniform(kw, (input_dim, out_dim), dtype=jnp.float32,
                                minval=-bound, maxval=bound)
    bias = jax.random.uniform(kb, (out_dim,), dtype=jnp.float32,
                              minval=-bound, maxval=bound)

    fwd = jax.jit(mlp_forward)
    out = fwd(x, weight, bias)
    jax.block_until_ready(out)

    # Reference in plain JAX (f32).  Tolerance relaxed for the bf16 MXU inputs.
    ref = x @ weight + bias
    ref = jnp.where(ref >= 0, ref, _NEG_SLOPE * ref)
    assert out.shape == (B, out_dim)
    assert jnp.allclose(out, ref, atol=2e-2, rtol=2e-2), "mismatch vs reference"

    print("KERNEL_OK")
</pallas_src>

<mosaic_0001>
module attributes {stable_mosaic.version = 11 : i64} {
  func.func @_mlp_kernel(%arg0: i32, %arg1: i32, %arg2: i32, %arg3: memref<8x32xbf16, #tpu.memory_space<vmem>>, %arg4: memref<32x16xbf16, #tpu.memory_space<vmem>>, %arg5: memref<1x16xf32, #tpu.memory_space<vmem>>, %arg6: memref<8x16xf32, #tpu.memory_space<vmem>>) attributes {dimension_semantics = [#tpu.dimension_semantics<parallel>, #tpu.dimension_semantics<parallel>, #tpu.dimension_semantics<arbitrary>], iteration_bounds = array<i64: 1, 1, 1>, scalar_prefetch = 0 : i64, scratch_operands = 0 : i64, tpu.core_type = #tpu.core_type<tc>, window_params = [{transform_indices = @transform_0, window_bounds = array<i64: 8, 32>}, {transform_indices = @transform_1, window_bounds = array<i64: 32, 16>}, {transform_indices = @transform_2, window_bounds = array<i64: 1, 16>}, {transform_indices = @transform_3, window_bounds = array<i64: 8, 16>}]} {
    %c0_i32 = arith.constant 0 : i32
    %0 = arith.cmpi eq, %arg2, %c0_i32 : i32
    %1 = arith.extui %0 : i1 to i32
    %c0_i32_0 = arith.constant 0 : i32
    %2 = arith.cmpi ne, %1, %c0_i32_0 : i32
    scf.if %2 {
      %cst_10 = arith.constant 0.000000e+00 : f32
      %12 = vector.broadcast %cst_10 : f32 to vector<8x16xf32>
      %c0_11 = arith.constant 0 : index
      %c0_12 = arith.constant 0 : index
      %13 = vector.load %arg6[%c0_11, %c0_12] : memref<8x16xf32, #tpu.memory_space<vmem>>, vector<8x16xf32>
      tpu.vector_store %arg6[%c0_11, %c0_12], %12 {strides = array<i32>} : memref<8x16xf32, #tpu.memory_space<vmem>>, vector<8x16xf32>,
    } else {
    }
    %c0 = arith.constant 0 : index
    %c0_1 = arith.constant 0 : index
    %3 = vector.load %arg6[%c0, %c0_1] : memref<8x16xf32, #tpu.memory_space<vmem>>, vector<8x16xf32>
    %c0_2 = arith.constant 0 : index
    %c0_3 = arith.constant 0 : index
    %4 = vector.load %arg3[%c0_2, %c0_3] : memref<8x32xbf16, #tpu.memory_space<vmem>>, vector<8x32xbf16>
    %c0_4 = arith.constant 0 : index
    %c0_5 = arith.constant 0 : index
    %5 = vector.load %arg4[%c0_4, %c0_5] : memref<32x16xbf16, #tpu.memory_space<vmem>>, vector<32x16xbf16>
    %cst = arith.constant dense<0.000000e+00> : vector<8x16xf32>
    %6 = tpu.matmul %4, %5, %cst {dimension_numbers = #tpu.dot_dimension_numbers<[1], [0], [0], [1], [0, 0, 1, 1], [], []>} : vector<8x32xbf16>, vector<32x16xbf16>, vector<8x16xf32> -> vector<8x16xf32>
    %7 = arith.addf %3, %6 : vector<8x16xf32>
    %c0_6 = arith.constant 0 : index
    %c0_7 = arith.constant 0 : index
    %8 = vector.load %arg6[%c0_6, %c0_7] : memref<8x16xf32, #tpu.memory_space<vmem>>, vector<8x16xf32>
    tpu.vector_store %arg6[%c0_6, %c0_7], %7 {strides = array<i32>} : memref<8x16xf32, #tpu.memory_space<vmem>>, vector<8x16xf32>,
    %c0_i32_8 = arith.constant 0 : i32
    %9 = arith.cmpi eq, %arg2, %c0_i32_8 : i32
    %10 = arith.extui %9 : i1 to i32
    %c0_i32_9 = arith.constant 0 : i32
    %11 = arith.cmpi ne, %10, %c0_i32_9 : i32
    scf.if %11 {
      %c0_10 = arith.constant 0 : index
      %c0_11 = arith.constant 0 : index
      %12 = vector.load %arg6[%c0_10, %c0_11] : memref<8x16xf32, #tpu.memory_space<vmem>>, vector<8x16xf32>
      %c0_12 = arith.constant 0 : index
      %c0_13 = arith.constant 0 : index
      %13 = vector.load %arg5[%c0_12, %c0_13] : memref<1x16xf32, #tpu.memory_space<vmem>>, vector<1x16xf32>
      %14 = vector.broadcast %13 : vector<1x16xf32> to vector<8x16xf32>
      %15 = arith.addf %12, %14 : vector<8x16xf32>
      %cst_14 = arith.constant 0.000000e+00 : f32
      %16 = vector.broadcast %cst_14 : f32 to vector<8x16xf32>
      %17 = arith.cmpf oge, %15, %16 : vector<8x16xf32>
      %cst_15 = arith.constant 0.00999999977 : f32
      %18 = vector.broadcast %cst_15 : f32 to vector<8x16xf32>
      %19 = arith.mulf %18, %15 : vector<8x16xf32>
      %20 = arith.select %17, %15, %19 : vector<8x16xi1>, vector<8x16xf32>
      %c0_16 = arith.constant 0 : index
      %c0_17 = arith.constant 0 : index
      %21 = vector.load %arg6[%c0_16, %c0_17] : memref<8x16xf32, #tpu.memory_space<vmem>>, vector<8x16xf32>
      tpu.vector_store %arg6[%c0_16, %c0_17], %20 {strides = array<i32>} : memref<8x16xf32, #tpu.memory_space<vmem>>, vector<8x16xf32>,
    } else {
    }
    return
  }
  func.func @transform_0(%arg0: i32, %arg1: i32, %arg2: i32) -> (i32, i32) {
    %c0_i32 = arith.constant 0 : i32
    return %arg0, %arg2 : i32, i32
  }
  func.func @transform_1(%arg0: i32, %arg1: i32, %arg2: i32) -> (i32, i32) {
    %c0_i32 = arith.constant 0 : i32
    return %arg2, %arg1 : i32, i32
  }
  func.func @transform_2(%arg0: i32, %arg1: i32, %arg2: i32) -> (i32, i32) {
    %c0_i32 = arith.constant 0 : i32
    %c0_i32_0 = arith.constant 0 : i32
    return %c0_i32, %arg1 : i32, i32
  }
  func.func @transform_3(%arg0: i32, %arg1: i32, %arg2: i32) -> (i32, i32) {
    %c0_i32 = arith.constant 0 : i32
    return %arg0, %arg1 : i32, i32
  }
}

</mosaic_0001>

<bundles_post_ra>
// kernel: mlp_forward.1
= control target key start
LH: loop header
LB: loop body
LE: loop exit
PB: predicated region body
PF: predicated region fallthrough
CT: control target
= control target key end

     0   :  { %v161_v1 = vmov 0.0   ;;  %vm162_vm0 = vmmov 0   ;;  %vm20_vm1 = vcmask 130048   ;;  %s211_s0 = inlined_call_operand.vmem [shape: bf16[8,32], index: 0, kind: input, shape index: {}]   ;;  %s212_s1 = inlined_call_operand.vmem [shape: bf16[32,16], index: 1, kind: input, shape index: {}]   ;;  %s213_s2 = inlined_call_operand.vmem [shape: f32[1,16], index: 2, kind: input, shape index: {}]   ;;  %s214_s3 = inlined_call_operand.hbm [shape: f32[8,16], index: 3, kind: output, shape index: {}]  }
   0x1   :  { %v135_v0 = vld [vmem:[%s212_s1] sm:$0xff]   ;;  %124 = vmatprep.subr.bf16.mxu0 %v161_v1  ;;  %v136_v2 = vld [vmem:[%s212_s1 + $0x8] sm:$0xff]   ;;  %128 = vmatprep.mubr.msk.bf16.mxu0 %vm162_vm0, %v161_v1 }
   0x2   :  { %125 = vmatpush3.bf16.msra.mxu0 %v135_v0 }
   0x3   :  { %8 = vsyncpa [#allocation3], 0  ;;  %126 = vmatprep.subr.bf16.mxu0 %v161_v1  ;;  %21 = vst.msk [vmem:[#allocation2] sm:$0xff] %vm20_vm1, %v161_v1  ;;  %v23_v3 = vld [vmem:[%s211_s0] sm:$0xf]  ;;  %vm40_vm2 = vcmask 261120  }
   0x4   :  { %v120_v10 = vld [vmem:[%s213_s2] ss:$0 sm:$0xff]  ;;  %s163_s19 = smov [#allocation2]  }
   0x5   :  { %s109_s20 = sshll.u32 %s163_s19, 4  ;;  %s110_s20 = int_to_ptr.vmem [resolvable:$true] %s109_s20 }
   0x6   :  { %127 = vmatpush3.bf16.msra.mxu0 %v136_v2  ;;  %s137_s0 = scalar_lea.vmem %s110_s20, 128  ;;  %p142_p1 = scmp.lt.s32.totalorder %s110_s20, %s110_s20 }
   0x7   :  { %p138_p0 = scmp.ne.s32.totalorder %s110_s20, %s137_s0  ;;  %p143_p2 = scmp.lt.s32.totalorder %s137_s0, %s137_s0 }
   0x9   :  { %129 = vmatmul.mubr.msk.bf16.vlgmr.msra.gmra.mrb[0].mxu0 %vm40_vm2, %v23_v3  ;;  %p144_p3 = por %p143_p2, %p142_p1 }
   0xa   :  { %v22_v4 = vld [vmem:[#allocation2] sm:$0xff] }
   0xb   :  { %p145_p4 = pnand %p144_p3, %p138_p0 }
  0xdc   :  { %v78_v5 = vpop.f32.mrb[0].mxu0 }
  0xdd   :  { %v84_v6 = vadd.f32 %v78_v5, %v22_v4  ;;  %v130_v7 = vpop.f32.mrb[1].mxu0 }
  0xde   :  { %v81_v8 = vpop.f32.mrb[2].mxu0 }
  0xdf   :  { %86 = vst.msk [vmem:[#allocation2] sm:$0xff] %vm20_vm1, %v84_v6  ;;  %v131_v9 = vpop.f32.mrb[3].mxu0 }
  0xe6   :  { %v90_v11 = vld [vmem:[#allocation2] sm:$0xff] }
  0xe7   :  { %v98_v12 = vadd.f32 %v120_v10, %v90_v11 }
  0xe9   :  { %vm99_vm3 = vcmp.ge.f32.partialorder %v98_v12, 0.0  ;;  %v100_v13 = vmul.f32 0.01, %v98_v12 }
  0xeb   :  { %v101_v14 = vsel %vm99_vm3, %v98_v12, %v100_v13 }
  0xec   :  { %102 = vst.msk [vmem:[#allocation2] sm:$0xff] %vm20_vm1, %v101_v14 }
  0xed   :  { %148 = shalt.err (!%p145_p4)
}
  0xee   :  { %s149_s2 = scalar_lea.hbm %s214_s3, 128 }
  0xef   :  { %p150_p5 = scmp.ne.s32.totalorder %s214_s3, %s149_s2  ;;  %p153_p6 = scmp.lt.u32.totalorder %s149_s2, %s214_s3 }
  0xf1   :  { %p155_p7 = pnand %p153_p6, %p150_p5 }
  0xf3   :  { %158 = shalt.err (!%p155_p7)
}
  0xf4   :  { %112 = dma.vmem_to_hbm [thread:$0]  %s110_s20, 128, %s214_s3, [#allocation3]  }
  0xf5   :  { %159 = dma.done.wait [#allocation3], 128  }
  0xf6   :  { %160 = vsyncadd [#allocation3], 4294967168 }
  0xf7   :  { %116 = vsyncpa [#allocation3], 1 }

</bundles_post_ra>
